<compile_context>
chip_gen: v6e
topology: v6e:2x2x1
jax: 0.10.0
libtpu: 0.0.40
codegen_flags: <defaults>
</compile_context>

<pallas_src>
import functools

import jax
import jax.numpy as jnp
import numpy as np
from jax.experimental import pallas as pl
from jax.experimental.pallas import tpu as pltpu


# ---------------------------------------------------------------------------
# kernels
# ---------------------------------------------------------------------------
def _ffn_kernel(x_ref, w1_ref, b1_ref, w2_ref, b2_ref, o_ref):
    """Eval-mode forward (dropout == identity): relu(x@w1+b1) @ w2 + b2."""
    h = jnp.dot(x_ref[...], w1_ref[...], preferred_element_type=jnp.float32)
    h = jnp.maximum(h + b1_ref[...], 0.0)
    y = jnp.dot(h.astype(w2_ref.dtype), w2_ref[...], preferred_element_type=jnp.float32)
    o_ref[...] = (y + b2_ref[...]).astype(o_ref.dtype)


def _ffn_dropout_kernel(x_ref, w1_ref, b1_ref, w2_ref, b2_ref, mask_ref, o_ref,
                        *, scale: float):
    """Training-mode forward: the keep-mask (f32, 0/1) is streamed in per row-tile.

    The mask multiply is folded as h * (mask * scale) so no zeros tensor is
    materialized (fewer VALU ops / vregs per tile).
    """
    h = jnp.dot(x_ref[...], w1_ref[...], preferred_element_type=jnp.float32)
    h = jnp.maximum(h + b1_ref[...], 0.0)
    h = h * (mask_ref[...] * jnp.float32(scale))
    y = jnp.dot(h.astype(w2_ref.dtype), w2_ref[...], preferred_element_type=jnp.float32)
    o_ref[...] = (y + b2_ref[...]).astype(o_ref.dtype)


# ---------------------------------------------------------------------------
# wrapper
# ---------------------------------------------------------------------------
def _pick_row_tile(m: int, block_rows: int) -> int:
    tm = min(block_rows, m)
    tm = max(8, (tm // 8) * 8)           # second-to-last block dim must be a multiple of 8
    return tm


def _vmem_limit_bytes(tm: int, d_model: int, d_ff: int) -> int:
    f32 = 4
    # x / out double-buffered, relu+mask intermediates, weights (worst case 2x), biases
    elems = (2 * tm * d_model + 2 * tm * d_model
             + 2 * tm * d_ff
             + 2 * (d_model * d_ff + d_ff * d_model)
             + 2 * (d_ff + d_model))
    budget = elems * f32 * 2             # 2x headroom for compiler temporaries
    # keep within every generation's physical VMEM (v7x has only 64 MiB)
    return int(min(max(budget, 16 * 1024 * 1024), 48 * 1024 * 1024))


def positionwise_feed_forward(x: jnp.ndarray,
                              w1: jnp.ndarray, b1: jnp.ndarray,
                              w2: jnp.ndarray, b2: jnp.ndarray,
                              *,
                              dropout_p: float = 0.1,
                              training: bool = False,
                              rng_key=None,
                              block_rows: int = 512) -> jnp.ndarray:
    """x: (..., d_model); w1: (d_model, d_ff); w2: (d_ff, d_model)."""
    orig_shape = x.shape
    d_model = orig_shape[-1]
    d_ff = w1.shape[1]

    x2 = x.reshape(-1, d_model)
    m = x2.shape[0]
    tm = _pick_row_tile(m, block_rows)
    grid = (pl.cdiv(m, tm),)

    b1_2d = b1.reshape(1, d_ff)
    b2_2d = b2.reshape(1, d_model)

    x_spec = pl.BlockSpec((tm, d_model), lambda i: (i, 0))
    w1_spec = pl.BlockSpec((d_model, d_ff), lambda i: (0, 0))   # resident across all tiles
    b1_spec = pl.BlockSpec((1, d_ff), lambda i: (0, 0))
    w2_spec = pl.BlockSpec((d_ff, d_model), lambda i: (0, 0))   # resident across all tiles
    b2_spec = pl.BlockSpec((1, d_model), lambda i: (0, 0))
    out_spec = pl.BlockSpec((tm, d_model), lambda i: (i, 0))
    out_shape = jax.ShapeDtypeStruct((m, d_model), x.dtype)

    compiler_params = pltpu.CompilerParams(
        dimension_semantics=("parallel",),              # lets v7x shard row tiles across both TCs
        vmem_limit_bytes=_vmem_limit_bytes(tm, d_model, d_ff),
    )

    if (not training) or dropout_p == 0.0:
        out2 = pl.pallas_call(
            _ffn_kernel,
            out_shape=out_shape,
            grid_spec=pltpu.PrefetchScalarGridSpec(
                num_scalar_prefetch=0,
                grid=grid,
                in_specs=[x_spec, w1_spec, b1_spec, w2_spec, b2_spec],
                out_specs=out_spec,
            ),
            compiler_params=compiler_params,
        )(x2, w1, b1_2d, w2, b2_2d)
        return out2.reshape(orig_shape)

    # Training-mode dropout.
    # TODO(synk): on-chip pltpu.prng_* dropout is omitted because prng_seed has no
    # CPU-interpret lowering; the keep-mask is generated with jax.random in the
    # wrapper and streamed into the fused kernel instead (identical semantics).
    if rng_key is None:
        rng_key = jax.random.PRNGKey(0)
    keep = jax.random.bernoulli(rng_key, 1.0 - dropout_p, (m, d_ff)).astype(jnp.float32)
    mask_spec = pl.BlockSpec((tm, d_ff), lambda i: (i, 0))
    kernel = functools.partial(_ffn_dropout_kernel, scale=float(1.0 / (1.0 - dropout_p)))

    out2 = pl.pallas_call(
        kernel,
        out_shape=out_shape,
        grid_spec=pltpu.PrefetchScalarGridSpec(
            num_scalar_prefetch=0,
            grid=grid,
            in_specs=[x_spec, w1_spec, b1_spec, w2_spec, b2_spec, mask_spec],
            out_specs=out_spec,
        ),
        compiler_params=compiler_params,
    )(x2, w1, b1_2d, w2, b2_2d, keep)
    return out2.reshape(orig_shape)


# ---------------------------------------------------------------------------
# self-test
# ---------------------------------------------------------------------------
if __name__ == "__main__":
    d_model, d_ff = 32, 64
    batch, seq = 2, 8
    p = 0.1

    key = jax.random.PRNGKey(0)
    kx, kw1, kb1, kw2, kb2, kdrop = jax.random.split(key, 6)
    x = jax.random.normal(kx, (batch, seq, d_model), dtype=jnp.float32)
    w1 = jax.random.normal(kw1, (d_model, d_ff), dtype=jnp.float32) * (1.0 / np.sqrt(d_model))
    b1 = jax.random.normal(kb1, (d_ff,), dtype=jnp.float32) * 0.01
    w2 = jax.random.normal(kw2, (d_ff, d_model), dtype=jnp.float32) * (1.0 / np.sqrt(d_ff))
    b2 = jax.random.normal(kb2, (d_model,), dtype=jnp.float32) * 0.01

    # eval-mode forward (dropout == identity) -- deterministic, check against reference
    out = positionwise_feed_forward(x, w1, b1, w2, b2, dropout_p=p, training=False)
    out = jax.block_until_ready(out)
    ref = jnp.maximum(x @ w1 + b1, 0.0) @ w2 + b2
    np.testing.assert_allclose(np.asarray(out), np.asarray(ref), rtol=1e-5, atol=1e-5)

    # training-mode forward -- mask is deterministic given the key, so exact check
    out_train = jax.block_until_ready(
        positionwise_feed_forward(x, w1, b1, w2, b2, dropout_p=p, training=True, rng_key=kdrop))
    keep = jax.random.bernoulli(kdrop, 1.0 - p, (batch * seq, d_ff)).astype(jnp.float32)
    keep = keep.reshape(batch, seq, d_ff)
    ref_train = (jnp.maximum(x @ w1 + b1, 0.0) * keep * (1.0 / (1.0 - p))) @ w2 + b2
    np.testing.assert_allclose(np.asarray(out_train), np.asarray(ref_train), rtol=1e-5, atol=1e-5)

    print("KERNEL_OK")
</pallas_src>

<mosaic_0001>
module attributes {stable_mosaic.version = 11 : i64} {
  func.func @_ffn_kernel(%arg0: i32, %arg1: memref<16x32xf32, #tpu.memory_space<vmem>>, %arg2: memref<32x64xf32, #tpu.memory_space<vmem>>, %arg3: memref<1x64xf32, #tpu.memory_space<vmem>>, %arg4: memref<64x32xf32, #tpu.memory_space<vmem>>, %arg5: memref<1x32xf32, #tpu.memory_space<vmem>>, %arg6: memref<16x32xf32, #tpu.memory_space<vmem>>) attributes {dimension_semantics = [#tpu.dimension_semantics<parallel>], iteration_bounds = array<i64: 1>, scalar_prefetch = 0 : i64, scratch_operands = 0 : i64, tpu.core_type = #tpu.core_type<tc>, window_params = [{transform_indices = @transform_0, window_bounds = array<i64: 16, 32>}, {pipeline_mode = #tpu.pipeline_mode<synchronous>, transform_indices = @transform_1, window_bounds = array<i64: 32, 64>}, {pipeline_mode = #tpu.pipeline_mode<synchronous>, transform_indices = @transform_2, window_bounds = array<i64: 1, 64>}, {pipeline_mode = #tpu.pipeline_mode<synchronous>, transform_indices = @transform_3, window_bounds = array<i64: 64, 32>}, {pipeline_mode = #tpu.pipeline_mode<synchronous>, transform_indices = @transform_4, window_bounds = array<i64: 1, 32>}, {transform_indices = @transform_5, window_bounds = array<i64: 16, 32>}]} {
    %c0 = arith.constant 0 : index
    %c0_0 = arith.constant 0 : index
    %0 = vector.load %arg1[%c0, %c0_0] : memref<16x32xf32, #tpu.memory_space<vmem>>, vector<16x32xf32>
    %c0_1 = arith.constant 0 : index
    %c0_2 = arith.constant 0 : index
    %1 = vector.load %arg2[%c0_1, %c0_2] : memref<32x64xf32, #tpu.memory_space<vmem>>, vector<32x64xf32>
    %cst = arith.constant dense<0.000000e+00> : vector<16x64xf32>
    %2 = tpu.matmul %0, %1, %cst {dimension_numbers = #tpu.dot_dimension_numbers<[1], [0], [0], [1], [0, 0, 1, 1], [], []>} : vector<16x32xf32>, vector<32x64xf32>, vector<16x64xf32> -> vector<16x64xf32>
    %c0_3 = arith.constant 0 : index
    %c0_4 = arith.constant 0 : index
    %3 = vector.load %arg3[%c0_3, %c0_4] : memref<1x64xf32, #tpu.memory_space<vmem>>, vector<1x64xf32>
    %4 = vector.broadcast %3 : vector<1x64xf32> to vector<16x64xf32>
    %5 = arith.addf %2, %4 : vector<16x64xf32>
    %cst_5 = arith.constant 0.000000e+00 : f32
    %6 = vector.broadcast %cst_5 : f32 to vector<16x64xf32>
    %7 = arith.maximumf %5, %6 : vector<16x64xf32>
    %c0_6 = arith.constant 0 : index
    %c0_7 = arith.constant 0 : index
    %8 = vector.load %arg4[%c0_6, %c0_7] : memref<64x32xf32, #tpu.memory_space<vmem>>, vector<64x32xf32>
    %cst_8 = arith.constant dense<0.000000e+00> : vector<16x32xf32>
    %9 = tpu.matmul %7, %8, %cst_8 {dimension_numbers = #tpu.dot_dimension_numbers<[1], [0], [0], [1], [0, 0, 1, 1], [], []>} : vector<16x64xf32>, vector<64x32xf32>, vector<16x32xf32> -> vector<16x32xf32>
    %c0_9 = arith.constant 0 : index
    %c0_10 = arith.constant 0 : index
    %10 = vector.load %arg5[%c0_9, %c0_10] : memref<1x32xf32, #tpu.memory_space<vmem>>, vector<1x32xf32>
    %11 = vector.broadcast %10 : vector<1x32xf32> to vector<16x32xf32>
    %12 = arith.addf %9, %11 : vector<16x32xf32>
    %c0_11 = arith.constant 0 : index
    %c0_12 = arith.constant 0 : index
    %13 = vector.load %arg6[%c0_11, %c0_12] : memref<16x32xf32, #tpu.memory_space<vmem>>, vector<16x32xf32>
    tpu.vector_store %arg6[%c0_11, %c0_12], %12 {strides = array<i32>} : memref<16x32xf32, #tpu.memory_space<vmem>>, vector<16x32xf32>,
    return
  }
  func.func @transform_0(%arg0: i32) -> (i32, i32) {
    %c0_i32 = arith.constant 0 : i32
    %c0_i32_0 = arith.constant 0 : i32
    return %arg0, %c0_i32 : i32, i32
  }
  func.func @transform_1(%arg0: i32) -> (i32, i32) {
    %c0_i32 = arith.constant 0 : i32
    %c0_i32_0 = arith.constant 0 : i32
    %c0_i32_1 = arith.constant 0 : i32
    return %c0_i32, %c0_i32_0 : i32, i32
  }
  func.func @transform_2(%arg0: i32) -> (i32, i32) {
    %c0_i32 = arith.constant 0 : i32
    %c0_i32_0 = arith.constant 0 : i32
    %c0_i32_1 = arith.constant 0 : i32
    return %c0_i32, %c0_i32_0 : i32, i32
  }
  func.func @transform_3(%arg0: i32) -> (i32, i32) {
    %c0_i32 = arith.constant 0 : i32
    %c0_i32_0 = arith.constant 0 : i32
    %c0_i32_1 = arith.constant 0 : i32
    return %c0_i32, %c0_i32_0 : i32, i32
  }
  func.func @transform_4(%arg0: i32) -> (i32, i32) {
    %c0_i32 = arith.constant 0 : i32
    %c0_i32_0 = arith.constant 0 : i32
    %c0_i32_1 = arith.constant 0 : i32
    return %c0_i32, %c0_i32_0 : i32, i32
  }
  func.func @transform_5(%arg0: i32) -> (i32, i32) {
    %c0_i32 = arith.constant 0 : i32
    %c0_i32_0 = arith.constant 0 : i32
    return %arg0, %c0_i32 : i32, i32
  }
}

</mosaic_0001>

<bundles_post_ra>
// kernel: tpu_custom_call.1
= control target key start
LH: loop header
LB: loop body
LE: loop exit
PB: predicated region body
PF: predicated region fallthrough
CT: control target
= control target key end

     0   :  { %vm34_vm0 = vcmask 261120   ;;  %s398_s0 = inlined_call_operand.vmem [shape: f32[16,32], index: 0, kind: input, shape index: {}]   ;;  %s399_s1 = inlined_call_operand.vmem [shape: f32[32,64], index: 1, kind: input, shape index: {}]   ;;  %s400_s2 = inlined_call_operand.vmem [shape: f32[1,64], index: 2, kind: input, shape index: {}]   ;;  %s401_s3 = inlined_call_operand.vmem [shape: f32[64,32], index: 3, kind: input, shape index: {}]   ;;  %s402_s4 = inlined_call_operand.vmem [shape: f32[1,32], index: 4, kind: input, shape index: {}]   ;;  %s403_s5 = inlined_call_operand.hbm [shape: f32[16,32], index: 5, kind: output, shape index: {}]  }
   0x1   :  { %v26_v0 = vld [vmem:[%s399_s1 + $0x18] sm:$0xff]  ;;  %v25_v1 = vld [vmem:[%s399_s1 + $0x10] sm:$0xff]  ;;  %v21_v2 = vld [vmem:[%s398_s0] sm:$0xff] }
   0x2   :  { %255 = vmatprep.subr.mxu0 %v26_v0  ;;  %v24_v3 = vld [vmem:[%s399_s1 + $0x8] sm:$0xff]  ;;  %263 = vmatprep.mubr.msk.f32.mxu0 %vm34_vm0, %v21_v2  ;;  %v125_v4 = vld [vmem:[%s401_s3 + $0x38] sm:$0xff]  ;;  %v124_v5 = vld [vmem:[%s401_s3 + $0x30] sm:$0xff] }
   0x3   :  { %256 = vmatpush3.msra.mxu0 %v26_v0  ;;  %266 = vmatprep.subr.mxu1 %v125_v4 }
   0x4   :  { %257 = vmatprep.subr.mxu0 %v25_v1 }
   0x5   :  { %10 = vsyncpa [#allocation3], 0  ;;  %258 = vmatpush3.msra.mxu0 %v25_v1  ;;  %v23_v6 = vld [vmem:[%s399_s1] sm:$0xff]  ;;  %267 = vmatpush3.msra.mxu1 %v125_v4  ;;  %v123_v7 = vld [vmem:[%s401_s3 + $0x28] sm:$0xff]  ;;  %vm133_vm1 = vcmask 523264  }
   0x6   :  { %259 = vmatprep.subr.mxu0 %v24_v3  ;;  %268 = vmatprep.subr.mxu1 %v124_v5  ;;  %v22_v8 = vld [vmem:[%s398_s0 + $0x8] sm:$0xff]  ;;  %v122_v9 = vld [vmem:[%s401_s3 + $0x20] sm:$0xff]  ;;  %v121_v10 = vld [vmem:[%s401_s3 + $0x18] sm:$0xff] }
   0x7   :  { %260 = vmatpush3.msra.mxu0 %v24_v3  ;;  %269 = vmatpush3.msra.mxu1 %v124_v5  ;;  %v120_v11 = vld [vmem:[%s401_s3 + $0x10] sm:$0xff]  ;;  %v119_v12 = vld [vmem:[%s401_s3 + $0x8] sm:$0xff]  ;;  %v118_v13 = vld [vmem:[%s401_s3] sm:$0xff]  ;;  %s310_s3 = smov [#allocation2]  }
   0x8   :  { %261 = vmatprep.subr.mxu0 %v23_v6  ;;  %270 = vmatprep.subr.mxu1 %v123_v7  ;;  %v233_v14 = vld [vmem:[%s400_s2] ss:$0 sm:$0xff]  ;;  %s222_s23 = sshll.u32 %s310_s3, 4  ;;  %s223_s23 = int_to_ptr.vmem [resolvable:$true] %s222_s23 }
   0x9   :  { %262 = vmatpush3.msra.mxu0 %v23_v6  ;;  %271 = vmatpush3.msra.mxu1 %v123_v7  ;;  %v236_v21 = vld [vmem:[%s402_s4] ss:$0 sm:$0xff]  ;;  %s288_s2 = scalar_lea.vmem %s223_s23, 256  ;;  %p293_p1 = scmp.lt.s32.totalorder %s223_s23, %s223_s23 }
   0xa   :  { %264 = vmatmul.mubr.msk.f32.vlgmr.msra.gmra.mxu0 %vm34_vm0, %v22_v8  ;;  %272 = vmatprep.subr.mxu1 %v122_v9  ;;  %p289_p0 = scmp.ne.s32.totalorder %s223_s23, %s288_s2  ;;  %p294_p2 = scmp.lt.s32.totalorder %s288_s2, %s288_s2 }
   0xb   :  { %273 = vmatpush3.msra.mxu1 %v122_v9 }
   0xc   :  { %274 = vmatprep.subr.mxu1 %v121_v10  ;;  %p295_p3 = por %p294_p2, %p293_p1 }
   0xd   :  { %275 = vmatpush3.msra.mxu1 %v121_v10 }
   0xe   :  { %276 = vmatprep.subr.mxu1 %v120_v11  ;;  %p296_p4 = pnand %p295_p3, %p289_p0 }
   0xf   :  { %277 = vmatpush3.msra.mxu1 %v120_v11 }
  0x10   :  { %278 = vmatprep.subr.mxu1 %v119_v12 }
  0x11   :  { %279 = vmatpush3.msra.mxu1 %v119_v12 }
  0x12   :  { %280 = vmatprep.subr.mxu1 %v118_v13 }
  0x13   :  { %281 = vmatpush3.msra.mxu1 %v118_v13 }
  0xca   :  { %v265_v15 = vpop.f32.mrf.mxu0 }
  0xcb   :  { %v113_v16 = vadd.f32 %v265_v15, %v233_v14 }
  0xcc   :  { %v107_v17 = vpop.f32.mrf.mxu0 }
  0xcd   :  { %v108_v18 = vadd.f32 %v233_v14, %v107_v17  ;;  %v117_v20 = vmax.f32 %v113_v16, 0.0 }
  0xcf   :  { %v116_v19 = vmax.f32 %v108_v18, 0.0 }
  0xd1   :  { %282 = vmatprep.mubr.msk.f32.mxu1 %vm133_vm1, %v116_v19 }
  0xd2   :  { %283 = vmatmul.mubr.msk.f32.vlgmr.msra.gmra.mxu1 %vm133_vm1, %v117_v20 }
 0x192   :  { %v284_v22 = vpop.f32.mrf.mxu1 }
 0x193   :  { %v212_v23 = vadd.f32 %v284_v22, %v236_v21 }
 0x194   :  { %v206_v24 = vpop.f32.mrf.mxu1 }
 0x195   :  { %216 = vst.msk [vmem:[#allocation2 + $0x8] sm:$0xff] %vm34_vm0, %v212_v23  ;;  %v207_v25 = vadd.f32 %v236_v21, %v206_v24 }
 0x197   :  { %215 = vst.msk [vmem:[#allocation2] sm:$0xff] %vm34_vm0, %v207_v25 }
 0x198   :  { %299 = shalt.err (!%p296_p4)
}
 0x199   :  { %s311_s24 = smov 128   ;;  %s312_s4 = smov 8  }
 0x19a   :  { %228 = dma.vmem_to_hbm [thread:$0]  %s223_s23, 256, %s403_s5, [#allocation3], %s311_s24, %s311_s24, %s312_s4  }
 0x19b   :  { %308 = dma.done.wait [#allocation3], 256  }
 0x19c   :  { %309 = vsyncadd [#allocation3], 4294967040 }
 0x19d   :  { %232 = vsyncpa [#allocation3], 1 }

</bundles_post_ra>
